<compile_context>
chip_gen: v6e
topology: v6e:2x2x1
jax: 0.10.0
libtpu: 0.0.40
codegen_flags: <defaults>
</compile_context>

<pallas_src>
import functools

import jax
import jax.numpy as jnp
from jax import lax
from jax.experimental import pallas as pl
from jax.experimental.pallas import tpu as pltpu

LANES = 128
MAX_TILE_ROWS = 2048  # 2048x128 f32 = 1 MiB per block


def _pe_hit(x, t, threshold):
    """Boolean 'bad pixel' mask in f32 precision."""
    xf = x.astype(jnp.float32)
    tf = t.astype(jnp.float32)
    err = jnp.abs(xf - tf)
    return jnp.logical_and(err >= jnp.float32(threshold),
                           err >= jnp.float32(0.05) * tf)


def _pe_partial_kernel(x_ref, t_ref, o_ref, *, threshold, n_valid, tile_rows,
                       need_mask):
    """Per-block partial sums (reduction='mean' path).

    Each grid step reduces its (tile_rows, 128) block to a (1, 1, 128)
    lane-dense partial sum (sublane reduce only; no per-step scalarization).
    """
    hit = _pe_hit(x_ref[...], t_ref[...], threshold)
    if need_mask:
        # Mask out rows/lanes past the original element count (handles both the
        # partial last grid block and any lane padding), independent of the
        # sign of `threshold`.
        i = pl.program_id(0)
        row = lax.broadcasted_iota(jnp.int32, (tile_rows, LANES), 0)
        lane = lax.broadcasted_iota(jnp.int32, (tile_rows, LANES), 1)
        flat = (i * tile_rows + row) * LANES + lane
        hit = jnp.logical_and(hit, flat < n_valid)
    contrib = hit.astype(jnp.float32)
    o_ref[...] = jnp.sum(contrib, axis=0).reshape(1, 1, LANES)


def _pe_none_kernel(x_ref, t_ref, o_ref, *, threshold):
    """Elementwise loss map (reduction='none')."""
    hit = _pe_hit(x_ref[...], t_ref[...], threshold)
    o_ref[...] = hit.astype(o_ref.dtype)


def pe_loss(x, target, threshold=3.0, reduction="mean"):
    assert x.shape == target.shape
    orig_shape = target.shape
    n = int(x.size)

    pad = (-n) % LANES
    xf = jnp.reshape(x, (-1,))
    tf = jnp.reshape(target, (-1,))
    if pad:
        # Rare fallback (numel not a multiple of 128). Padded elements are
        # excluded in-kernel via the flat-index mask (mean) / sliced off (none).
        xf = jnp.pad(xf, (0, pad))
        tf = jnp.pad(tf, (0, pad))
    rows = (n + pad) // LANES
    xv = xf.reshape(rows, LANES)
    tv = tf.reshape(rows, LANES)

    # Largest tile that keeps double-buffered footprint small; if the whole
    # problem fits in one block, use the full extent (always a legal block).
    tile_rows = rows if rows <= MAX_TILE_ROWS else MAX_TILE_ROWS
    num_blocks = int(pl.cdiv(rows, tile_rows))
    need_mask = (pad != 0) or (rows % tile_rows != 0)

    cparams = pltpu.CompilerParams(
        dimension_semantics=("parallel",),
        vmem_limit_bytes=32 * 1024 * 1024,
    )
    in_specs = [
        pl.BlockSpec((tile_rows, LANES), lambda i: (i, 0)),
        pl.BlockSpec((tile_rows, LANES), lambda i: (i, 0)),
    ]

    if reduction == "mean":
        kernel = functools.partial(
            _pe_partial_kernel,
            threshold=float(threshold),
            n_valid=n,
            tile_rows=int(tile_rows),
            need_mask=need_mask,
        )
        partials = pl.pallas_call(
            kernel,
            out_shape=jax.ShapeDtypeStruct((num_blocks, 1, LANES), jnp.float32),
            grid_spec=pl.GridSpec(
                grid=(num_blocks,),
                in_specs=in_specs,
                out_specs=pl.BlockSpec((1, 1, LANES), lambda i: (i, 0, 0)),
            ),
            compiler_params=cparams,
        )(xv, tv)
        return jnp.sum(partials) / jnp.float32(n)
    else:  # reduction == 'none'
        kernel = functools.partial(_pe_none_kernel, threshold=float(threshold))
        out = pl.pallas_call(
            kernel,
            out_shape=jax.ShapeDtypeStruct((rows, LANES), target.dtype),
            grid_spec=pl.GridSpec(
                grid=(num_blocks,),
                in_specs=in_specs,
                out_specs=pl.BlockSpec((tile_rows, LANES), lambda i: (i, 0)),
            ),
            compiler_params=cparams,
        )(xv, tv)
        if pad:
            out = out.reshape(-1)[:n]
        return out.reshape(orig_shape)


class PE:
    """Thin stateless wrapper mirroring the PyTorch module interface."""

    def __init__(self, threshold=3, reduction="mean"):
        self.threshold = threshold
        self.reduction = reduction

    def __call__(self, x, target):
        return pe_loss(x, target, threshold=self.threshold,
                       reduction=self.reduction)


if __name__ == "__main__":
    key = jax.random.PRNGKey(0)
    k1, k2 = jax.random.split(key)

    # Small disparity-map-like inputs, NCHW.
    shape = (2, 4, 16, 16)
    target = jax.random.uniform(k1, shape, jnp.float32, minval=0.0, maxval=50.0)
    x = target + 5.0 * jax.random.normal(k2, shape, jnp.float32)

    # reduction='mean' (the default PE path)
    out_mean = pe_loss(x, target, threshold=3.0, reduction="mean")
    out_mean = jax.block_until_ready(out_mean)

    # reduction='none' path as well
    out_none = pe_loss(x, target, threshold=3.0, reduction="none")
    out_none = jax.block_until_ready(out_none)

    # Pure-JAX reference for verification.
    err = jnp.abs(x - target)
    mask = jnp.logical_and(err >= 3.0, err >= 0.05 * target)
    ref_none = jnp.where(mask, 1.0, 0.0).astype(jnp.float32)
    ref_mean = ref_none.mean()

    assert out_none.shape == shape
    assert jnp.allclose(out_none, ref_none), "elementwise loss mismatch"
    assert jnp.allclose(out_mean, ref_mean, atol=1e-6), (out_mean, ref_mean)

    print("KERNEL_OK")
</pallas_src>

<mosaic_0001>
module attributes {stable_mosaic.version = 11 : i64} {
  func.func @_pe_partial_kernel(%arg0: i32, %arg1: memref<16x128xf32, #tpu.memory_space<vmem>>, %arg2: memref<16x128xf32, #tpu.memory_space<vmem>>, %arg3: memref<1x1x128xf32, #tpu.memory_space<vmem>>) attributes {dimension_semantics = [#tpu.dimension_semantics<parallel>], iteration_bounds = array<i64: 1>, scalar_prefetch = 0 : i64, scratch_operands = 0 : i64, tpu.core_type = #tpu.core_type<tc>, window_params = [{transform_indices = @transform_0, window_bounds = array<i64: 16, 128>}, {transform_indices = @transform_1, window_bounds = array<i64: 16, 128>}, {transform_indices = @transform_2, window_bounds = array<i64: 1, 1, 128>}]} {
    %c0 = arith.constant 0 : index
    %c0_0 = arith.constant 0 : index
    %0 = vector.load %arg1[%c0, %c0_0] : memref<16x128xf32, #tpu.memory_space<vmem>>, vector<16x128xf32>
    %c0_1 = arith.constant 0 : index
    %c0_2 = arith.constant 0 : index
    %1 = vector.load %arg2[%c0_1, %c0_2] : memref<16x128xf32, #tpu.memory_space<vmem>>, vector<16x128xf32>
    %2 = arith.subf %0, %1 : vector<16x128xf32>
    %3 = math.absf %2 : vector<16x128xf32>
    %cst = arith.constant 3.000000e+00 : f32
    %4 = vector.broadcast %cst : f32 to vector<16x128xf32>
    %5 = arith.cmpf oge, %3, %4 : vector<16x128xf32>
    %cst_3 = arith.constant 5.000000e-02 : f32
    %6 = vector.broadcast %cst_3 : f32 to vector<16x128xf32>
    %7 = arith.mulf %6, %1 : vector<16x128xf32>
    %8 = arith.cmpf oge, %3, %7 : vector<16x128xf32>
    %9 = arith.andi %5, %8 : vector<16x128xi1>
    %10 = arith.extui %9 : vector<16x128xi1> to vector<16x128xi32>
    %11 = arith.sitofp %10 : vector<16x128xi32> to vector<16x128xf32>
    %cst_4 = arith.constant dense<0.000000e+00> : vector<128xf32>
    %12 = vector.multi_reduction <add>, %11, %cst_4 [0] : vector<16x128xf32> to vector<128xf32>
    %13 = vector.shape_cast %12 : vector<128xf32> to vector<1x1x128xf32>
    %c0_5 = arith.constant 0 : index
    %c0_6 = arith.constant 0 : index
    %c0_7 = arith.constant 0 : index
    %14 = vector.load %arg3[%c0_5, %c0_6, %c0_7] : memref<1x1x128xf32, #tpu.memory_space<vmem>>, vector<1x1x128xf32>
    tpu.vector_store %arg3[%c0_5, %c0_6, %c0_7], %13 {strides = array<i32>} : memref<1x1x128xf32, #tpu.memory_space<vmem>>, vector<1x1x128xf32>,
    return
  }
  func.func @transform_0(%arg0: i32) -> (i32, i32) {
    %c0_i32 = arith.constant 0 : i32
    %c0_i32_0 = arith.constant 0 : i32
    return %arg0, %c0_i32 : i32, i32
  }
  func.func @transform_1(%arg0: i32) -> (i32, i32) {
    %c0_i32 = arith.constant 0 : i32
    %c0_i32_0 = arith.constant 0 : i32
    return %arg0, %c0_i32 : i32, i32
  }
  func.func @transform_2(%arg0: i32) -> (i32, i32, i32) {
    %c0_i32 = arith.constant 0 : i32
    %c0_i32_0 = arith.constant 0 : i32
    %c0_i32_1 = arith.constant 0 : i32
    return %arg0, %c0_i32, %c0_i32_0 : i32, i32, i32
  }
}

</mosaic_0001>

<bundles_post_ra>
// kernel: tpu_custom_call.1
= control target key start
LH: loop header
LB: loop body
LE: loop exit
PB: predicated region body
PF: predicated region fallthrough
CT: control target
= control target key end

     0   :  { %7 = vsyncpa [#allocation3], 0  ;;  %s188_s0 = inlined_call_operand.hbm [shape: f32[16,128], index: 0, kind: input, shape index: {}]   ;;  %s189_s1 = inlined_call_operand.hbm [shape: f32[16,128], index: 1, kind: input, shape index: {}]   ;;  %s190_s2 = inlined_call_operand.hbm [shape: f32[1,1,128], index: 2, kind: output, shape index: {}]  }
   0x1   :  { %8 = vsyncpa [#allocation6], 0 }
   0x2   :  { %9 = vsyncpa [#allocation4], 0  ;;  %s158_s9 = smov [#allocation2]  }
   0x3   :  { %s15_s10 = sshll.u32 %s158_s9, 4  ;;  %s16_s10 = int_to_ptr.vmem [resolvable:$true] %s15_s10 }
   0x4   :  { %s100_s11 = scalar_lea.vmem %s16_s10, 256  ;;  %p105_p1 = scmp.lt.s32.totalorder %s16_s10, %s16_s10 }
   0x5   :  { %p101_p0 = scmp.ne.s32.totalorder %s16_s10, %s100_s11  ;;  %p106_p2 = scmp.lt.s32.totalorder %s100_s11, %s100_s11 }
   0x7   :  { %p107_p3 = por %p106_p2, %p105_p1 }
   0x9   :  { %p108_p4 = pnand %p107_p3, %p101_p0 }
   0xb   :  { %111 = shalt.err (!%p108_p4)
}
   0xc   :  { %s159_s12 = smov 128   ;;  %s160_s13 = smov 8  }
   0xd   :  { %21 = dma.hbm_to_vmem [thread:$0]  %s188_s0, 256, %s16_s10, [#allocation3], %s159_s12, %s159_s12, %s160_s13  }
   0xe   :  { %s161_s16 = smov [#allocation5]  }
   0xf   :  { %s27_s17 = sshll.u32 %s161_s16, 4  ;;  %s28_s17 = int_to_ptr.vmem [resolvable:$true] %s27_s17 }
  0x10   :  { %s120_s18 = scalar_lea.vmem %s28_s17, 256  ;;  %p125_p6 = scmp.lt.s32.totalorder %s28_s17, %s28_s17 }
  0x11   :  { %p121_p5 = scmp.ne.s32.totalorder %s28_s17, %s120_s18  ;;  %p126_p7 = scmp.lt.s32.totalorder %s120_s18, %s120_s18 }
  0x13   :  { %p127_p8 = por %p126_p7, %p125_p6 }
  0x15   :  { %p128_p9 = pnand %p127_p8, %p121_p5 }
  0x17   :  { %131 = shalt.err (!%p128_p9)
}
  0x18   :  { %33 = dma.hbm_to_vmem [thread:$0]  %s189_s1, 256, %s28_s17, [#allocation6], %s159_s12, %s159_s12, %s160_s13  }
  0x19   :  { %152 = dma.done.wait [#allocation3], 256  }
  0x1a   :  { %153 = vsyncadd [#allocation3], 4294967040 }
  0x1b   :  { %154 = dma.done.wait [#allocation6], 256  }
  0x1c   :  { %155 = vsyncadd [#allocation6], 4294967040  ;;  %v40_v0 = vld [vmem:[#allocation2] sm:$0xff]  ;;  %v41_v1 = vld [vmem:[#allocation2 + $0x8] sm:$0xff]  ;;  %v162_v10 = vmov 0.0   ;;  %s163_s0 = smov [#allocation7]  }
  0x1d   :  { %v42_v2 = vld [vmem:[#allocation5] sm:$0xff]  ;;  %v43_v3 = vld [vmem:[#allocation5 + $0x8] sm:$0xff]  ;;  %s74_s1 = sshll.u32 %s163_s0, 4  ;;  %s75_s1 = int_to_ptr.vmem [resolvable:$true] %s74_s1 }
  0x1e   :  { %v44_v4 = vsub.f32 %v40_v0, %v42_v2  ;;  %v50_v5 = vmul.f32 0.05, %v42_v2  ;;  %v45_v6 = vsub.f32 %v41_v1, %v43_v3  ;;  %v51_v7 = vmul.f32 0.05, %v43_v3  ;;  %s132_s21 = scalar_lea.vmem %s75_s1, 16  ;;  %s136_s22 = scalar_lea.vmem %s75_s1, 32 }
  0x1f   :  { %p133_p10 = scmp.ne.s32.totalorder %s75_s1, %s132_s21  ;;  %p137_p11 = scmp.lt.s32.totalorder %s75_s1, %s75_s1 }
  0x20   :  { %v46_v8 = vand.u32 2147483647, %v44_v4  ;;  %v47_v9 = vand.u32 2147483647, %v45_v6  ;;  %p138_p12 = scmp.lt.s32.totalorder %s136_s22, %s132_s21 }
  0x22   :  { %vm48_vm0 = vcmp.ge.f32.partialorder %v46_v8, 3.0  ;;  %vm52_vm1 = vcmp.ge.f32.partialorder %v46_v8, %v50_v5  ;;  %vm49_vm2 = vcmp.ge.f32.partialorder %v47_v9, 3.0  ;;  %vm53_vm3 = vcmp.ge.f32.partialorder %v47_v9, %v51_v7  ;;  %p139_p13 = por %p138_p12, %p137_p11 }
  0x23   :  { %vm54_vm4 = vmand %vm48_vm0, %vm52_vm1 }
  0x24   :  { %vm55_vm5 = vmand %vm49_vm2, %vm53_vm3  ;;  %v84_v11 = vsel %vm54_vm4, 1.0, %v162_v10  ;;  %p140_p0 = pnand %p139_p13, %p133_p10 }
  0x25   :  { %v85_v12 = vsel %vm55_vm5, 1.0, %v162_v10 }
  0x26   :  { %v60_v13 = vadd.f32 %v85_v12, %v84_v11 }
  0x28   :  { %v61_v14 = vrot.slane %v60_v13, 4 }
  0x2a   :  { %v62_v15 = vadd.f32 %v61_v14, %v60_v13 }
  0x2c   :  { %v63_v16 = vrot.slane %v62_v15, 2 }
  0x2e   :  { %v64_v17 = vadd.f32 %v63_v16, %v62_v15 }
  0x30   :  { %v65_v18 = vrot.slane %v64_v17, 1 }
  0x32   :  { %v66_v19 = vadd.f32 %v65_v18, %v64_v17 }
  0x34   :  { %67 = vst [vmem:[#allocation7] sm:$0x1] %v66_v19 }
  0x35   :  { %143 = shalt.err (!%p140_p0)
}
  0x36   :  { %77 = dma.vmem_to_hbm [thread:$0]  %s75_s1, 16, %s190_s2, [#allocation4]  }
  0x37   :  { %156 = dma.done.wait [#allocation4], 16  }
  0x38   :  { %157 = vsyncadd [#allocation4], 4294967280 }
  0x39   :  { %81 = vsyncpa [#allocation3], 1 }
  0x3a   :  { %82 = vsyncpa [#allocation6], 1 }
  0x3b   :  { %83 = vsyncpa [#allocation4], 1 }

</bundles_post_ra>
